<compile_context>
chip_gen: v6e
topology: v6e:2x2x1
jax: 0.10.0
libtpu: 0.0.40
codegen_flags: <defaults>
</compile_context>

<pallas_src>
import functools

import jax
import jax.numpy as jnp
from jax import lax
from jax.experimental import pallas as pl
from jax.experimental.pallas import tpu as pltpu

_LANES = 128


def _round_up(x, m):
    return (x + m - 1) // m * m


def _pick_row_tile(ho, wo, max_rows):
    """Largest TH dividing Ho with TH*Wo <= max_rows and (TH*Wo) % 8 == 0.

    Fallback TH = Ho gives ROWS == Ho*Wo, the FULL axis-1 extent of the
    (N, Ho*Wo, Coutp) intermediate, which always satisfies the (8, 128)
    BlockSpec divisibility rule."""
    best = None
    for th in range(1, ho + 1):
        if ho % th == 0 and th * wo <= max_rows and (th * wo) % 8 == 0:
            best = th
    return best if best is not None else ho


def _pick_m_tile(hw, coutp, itemsize, budget_bytes):
    """Largest TM dividing Ho*Wo, multiple of 8, with TM*Coutp*itemsize within
    budget.  Fallback TM = Ho*Wo (full axis extent) is always legal."""
    cap = max(8, budget_bytes // (coutp * itemsize))
    best = None
    for tm in range(8, min(hw, cap) + 1, 8):
        if hw % tm == 0:
            best = tm
    return best if best is not None else hw


def _make_conv_stats_kernel(KH, KW, stride, TH, Wo, Cin):
    """Pass 1: VMEM im2col + single K=KH*KW*Cin MXU matmul + per-image stats."""
    K = KH * KW * Cin

    def kernel(x_ref, w_ref, conv_ref, sum_ref, sumsq_ref):
        # x_ref:    (1, Hp, Wp, Cin)        padded NHWC image n (compute dtype)
        # w_ref:    (K, Coutp)              im2col weight, lane-dense
        # conv_ref: (1, TH*Wo, Coutp)       conv rows for this (image, row tile)
        # sum_ref / sumsq_ref: (1, 1, Coutp) per-image partial batch stats (f32)
        t = pl.program_id(1)
        h0 = pl.multiple_of(t * (TH * stride), TH * stride)

        # One strided 3-D window load per (kh, kw) tap; concatenate along the
        # channel (lane) axis to build a (TH*Wo, KH*KW*Cin) patch in VMEM.
        wins = []
        for i in range(KH):
            for j in range(KW):
                if stride == 1:
                    win = x_ref[0, pl.ds(h0 + i, TH), pl.ds(j, Wo), :]
                else:
                    win = x_ref[0, pl.ds(h0 + i, TH, stride),
                                pl.ds(j, Wo, stride), :]
                wins.append(win)
        patch = wins[0] if len(wins) == 1 else jnp.concatenate(wins, axis=-1)
        patch = patch.reshape(TH * Wo, K)

        # Single matmul with the full K = KH*KW*Cin contraction (f32 accum).
        conv = jnp.dot(patch, w_ref[...], preferred_element_type=jnp.float32)

        # Single lane-dense store of the tile (no read-modify-write chain).
        conv_ref[0] = conv.astype(conv_ref.dtype)

        # Per-image partial stats accumulated in the resident output block
        # across the row-tile ("arbitrary") axis only; image axis stays
        # "parallel" so v7x's two TensorCores can split it.
        @pl.when(t == 0)
        def _init():
            sum_ref[...] = jnp.zeros_like(sum_ref)
            sumsq_ref[...] = jnp.zeros_like(sumsq_ref)

        sum_ref[...] += jnp.sum(conv, axis=0).reshape(1, 1, -1)
        sumsq_ref[...] += jnp.sum(conv * conv, axis=0).reshape(1, 1, -1)

    return kernel


def _bn_lrelu_kernel(conv_ref, a_ref, b_ref, o_ref):
    # Pass 2: BN folded into one FMA (a = gamma*inv_std, b = beta - mean*a)
    # + LeakyReLU(0.2) on lane-dense tiles; output aliases the conv buffer.
    y = conv_ref[...].astype(jnp.float32) * a_ref[...] + b_ref[...]
    o_ref[...] = jnp.where(y > 0, y, 0.2 * y).astype(o_ref.dtype)


@functools.partial(
    jax.jit,
    static_argnames=("stride", "padding", "compute_dtype", "max_tile_rows",
                     "tile_budget_bytes"))
def conv2d_block_forward(x_nchw, weight, gamma, beta, *, stride=1, padding=0,
                         compute_dtype=jnp.float32, max_tile_rows=512,
                         tile_budget_bytes=2 * 1024 * 1024):
    """Forward of Conv2dBlock.

    x_nchw: (N, Cin, H, W)      float32
    weight: (Cout, Cin, KH, KW) float32 (PyTorch conv weight layout)
    gamma, beta: (Cout,)        float32 (BatchNorm affine params)
    compute_dtype: MXU input dtype.  bfloat16 is recommended on ALL
        generations (v5e/v6e/v7x MXUs are natively bf16; also halves the
        image VMEM footprint and the conv-intermediate HBM traffic);
        float32 (default) keeps exact module semantics.
    max_tile_rows / tile_budget_bytes: tile-size knobs (v6e has the VMEM
        headroom to raise them; the defaults fit v5e/v7x scoped budgets).
    returns: (N, Cout, Ho, Wo)  float32
    """
    N, Cin, H, W = x_nchw.shape
    Cout, _, KH, KW = weight.shape
    Ho = (H + 2 * padding - KH) // stride + 1
    Wo = (W + 2 * padding - KW) // stride + 1
    Hp, Wp = H + 2 * padding, W + 2 * padding
    Coutp = _round_up(Cout, _LANES)
    HW = Ho * Wo
    M = N * HW
    K = KH * KW * Cin

    cdt = jnp.dtype(compute_dtype)
    store_dtype = jnp.float32 if cdt == jnp.dtype(jnp.float32) else jnp.bfloat16
    s_itemsize = jnp.dtype(store_dtype).itemsize

    TH = _pick_row_tile(Ho, Wo, max_tile_rows)
    HO_TILES = Ho // TH
    ROWS = TH * Wo

    # ---- wrapper glue: NCHW -> padded NHWC; weight -> im2col (K, Coutp) ----
    # TODO(synk): accept/emit NHWC and fold the zero-pad into pass 1 via a
    # manual halo DMA to remove this extra HBM read+write of the input.
    x_nhwc = jnp.transpose(x_nchw, (0, 2, 3, 1))
    xp = jnp.pad(x_nhwc,
                 ((0, 0), (padding, padding), (padding, padding), (0, 0)))
    xp = xp.astype(compute_dtype)
    w_k = jnp.transpose(weight, (2, 3, 1, 0)).reshape(K, Cout)
    w_k = jnp.pad(w_k, ((0, 0), (0, Coutp - Cout))).astype(compute_dtype)

    # Bound the largest VMEM consumer: the full padded image block is
    # double-buffered by default; single-buffer it when large (its block index
    # only changes once per image, so the lost prefetch overlap is negligible)
    # so pass 1 stays inside v7x's 32 MiB scoped / v5e's 16 MiB scoped VMEM.
    img_bytes = Hp * Wp * Cin * jnp.dtype(compute_dtype).itemsize
    if img_bytes > (6 << 20):
        x_spec = pl.BlockSpec((1, Hp, Wp, Cin), lambda n, t: (n, 0, 0, 0),
                              pipeline_mode=pl.Buffered(1))
    else:
        x_spec = pl.BlockSpec((1, Hp, Wp, Cin), lambda n, t: (n, 0, 0, 0))

    # ---- pass 1: conv (single MXU matmul per tile) + per-image stats ----
    kernel1 = _make_conv_stats_kernel(KH, KW, stride, TH, Wo, Cin)
    conv3, csum, csumsq = pl.pallas_call(
        kernel1,
        grid=(N, HO_TILES),
        in_specs=[
            x_spec,
            pl.BlockSpec((K, Coutp), lambda n, t: (0, 0)),
        ],
        out_specs=(
            pl.BlockSpec((1, ROWS, Coutp), lambda n, t: (n, t, 0)),
            pl.BlockSpec((1, 1, Coutp), lambda n, t: (n, 0, 0)),
            pl.BlockSpec((1, 1, Coutp), lambda n, t: (n, 0, 0)),
        ),
        out_shape=(
            jax.ShapeDtypeStruct((N, HW, Coutp), store_dtype),
            jax.ShapeDtypeStruct((N, 1, Coutp), jnp.float32),
            jax.ShapeDtypeStruct((N, 1, Coutp), jnp.float32),
        ),
        compiler_params=pltpu.CompilerParams(
            dimension_semantics=("parallel", "arbitrary")),
    )(xp, w_k)

    # ---- tiny XLA finalize: Welford/Chan merge of per-image partials and
    # fold BN into a single FMA (a, b). ----
    Mi = float(HW)
    s = csum[:, 0, :]                      # (N, Coutp) per-image sums
    q = csumsq[:, 0, :]                    # (N, Coutp) per-image sum of squares
    m_n = s / Mi                           # per-image means
    m2_n = q - Mi * m_n * m_n              # per-image centered sum of squares
    mean = jnp.mean(m_n, axis=0, keepdims=True)            # (1, Coutp)
    m2 = (jnp.sum(m2_n, axis=0, keepdims=True)
          + Mi * jnp.sum((m_n - mean) ** 2, axis=0, keepdims=True))
    var = jnp.maximum(m2 / float(M), 0.0)  # biased var (PyTorch BN training)
    inv_std = lax.rsqrt(var + 1e-3)
    gamma_p = jnp.pad(gamma.astype(jnp.float32).reshape(1, Cout),
                      ((0, 0), (0, Coutp - Cout)))
    beta_p = jnp.pad(beta.astype(jnp.float32).reshape(1, Cout),
                     ((0, 0), (0, Coutp - Cout)))
    a = gamma_p * inv_std                  # (1, Coutp)
    b = beta_p - mean * a                  # (1, Coutp)

    # ---- pass 2: normalize + LeakyReLU in place (aliases the conv buffer) ----
    TM = _pick_m_tile(HW, Coutp, s_itemsize, tile_budget_bytes)
    out3 = pl.pallas_call(
        _bn_lrelu_kernel,
        grid=(N, HW // TM),
        in_specs=[
            pl.BlockSpec((1, TM, Coutp), lambda n, t: (n, t, 0)),
            pl.BlockSpec((1, Coutp), lambda n, t: (0, 0)),
            pl.BlockSpec((1, Coutp), lambda n, t: (0, 0)),
        ],
        out_specs=pl.BlockSpec((1, TM, Coutp), lambda n, t: (n, t, 0)),
        out_shape=jax.ShapeDtypeStruct((N, HW, Coutp), store_dtype),
        input_output_aliases={0: 0},
        compiler_params=pltpu.CompilerParams(
            dimension_semantics=("parallel", "parallel")),
    )(conv3, a, b)

    # ---- glue: drop channel padding, back to NCHW, restore input dtype ----
    out = out3[:, :, :Cout].reshape(N, Ho, Wo, Cout)
    return jnp.transpose(out, (0, 3, 1, 2)).astype(x_nchw.dtype)


def _reference(x_nchw, weight, gamma, beta, stride, padding):
    conv = lax.conv_general_dilated(
        x_nchw, weight, window_strides=(stride, stride),
        padding=[(padding, padding), (padding, padding)],
        dimension_numbers=("NCHW", "OIHW", "NCHW"))
    mean = jnp.mean(conv, axis=(0, 2, 3), keepdims=True)
    var = jnp.mean((conv - mean) ** 2, axis=(0, 2, 3), keepdims=True)
    y = (conv - mean) * lax.rsqrt(var + 1e-3)
    y = y * gamma.reshape(1, -1, 1, 1) + beta.reshape(1, -1, 1, 1)
    return jnp.where(y > 0, y, 0.2 * y)


if __name__ == "__main__":
    # Conv2dBlock(n_in=4, n_out=8, kernel_size=3, stride=1, padding=1)
    n_in, n_out, ksize, stride, padding = 4, 8, 3, 1, 1
    N, H, W = 2, 16, 16

    key = jax.random.PRNGKey(0)
    kx, kw_, kg, kb = jax.random.split(key, 4)
    x = jax.random.normal(kx, (N, n_in, H, W), dtype=jnp.float32)
    weight = jax.random.normal(kw_, (n_out, n_in, ksize, ksize),
                               dtype=jnp.float32) * 0.1
    gamma = 1.0 + 0.1 * jax.random.normal(kg, (n_out,), dtype=jnp.float32)
    beta = 0.1 * jax.random.normal(kb, (n_out,), dtype=jnp.float32)

    ref = _reference(x, weight, gamma, beta, stride, padding)

    # f32 MXU path (exact module semantics); small row tiles exercise the
    # multi-tile per-image stats accumulation plus the multi-image grid.
    out = conv2d_block_forward(x, weight, gamma, beta, stride=stride,
                               padding=padding, compute_dtype=jnp.float32,
                               max_tile_rows=96)
    out = jax.block_until_ready(out)
    assert out.shape == (N, n_out, H, W), out.shape
    err_f32 = float(jnp.max(jnp.abs(out - ref)))
    assert jnp.allclose(out, ref, atol=2e-4, rtol=2e-4), err_f32

    # bf16 MXU-input + bf16 conv-intermediate path (recommended on v5e/v6e/
    # v7x); f32 accumulation & stats.  Combined ~1e-3 relative error.
    out_bf16 = conv2d_block_forward(x, weight, gamma, beta, stride=stride,
                                    padding=padding,
                                    compute_dtype=jnp.bfloat16)
    out_bf16 = jax.block_until_ready(out_bf16)
    err_bf16 = float(jnp.max(jnp.abs(out_bf16 - ref)))
    assert jnp.allclose(out_bf16, ref, atol=1e-1, rtol=5e-2), err_bf16

    print("KERNEL_OK")
</pallas_src>

<mosaic_0001>
module attributes {stable_mosaic.version = 11 : i64} {
  func.func @kernel(%arg0: i32, %arg1: i32, %arg2: memref<1x18x18x4xf32, #tpu.memory_space<vmem>>, %arg3: memref<36x128xf32, #tpu.memory_space<vmem>>, %arg4: memref<1x64x128xf32, #tpu.memory_space<vmem>>, %arg5: memref<1x1x128xf32, #tpu.memory_space<vmem>>, %arg6: memref<1x1x128xf32, #tpu.memory_space<vmem>>) attributes {dimension_semantics = [#tpu.dimension_semantics<parallel>, #tpu.dimension_semantics<arbitrary>], iteration_bounds = array<i64: 2, 4>, scalar_prefetch = 0 : i64, scratch_operands = 0 : i64, tpu.core_type = #tpu.core_type<tc>, window_params = [{transform_indices = @transform_0, window_bounds = array<i64: 1, 18, 18, 4>}, {pipeline_mode = #tpu.pipeline_mode<synchronous>, transform_indices = @transform_1, window_bounds = array<i64: 36, 128>}, {transform_indices = @transform_2, window_bounds = array<i64: 1, 64, 128>}, {transform_indices = @transform_3, window_bounds = array<i64: 1, 1, 128>}, {transform_indices = @transform_4, window_bounds = array<i64: 1, 1, 128>}]} {
    %c4_i32 = arith.constant 4 : i32
    %0 = arith.muli %arg1, %c4_i32 : i32
    %1 = tpu.assume_multiple %0, 4 : i32
    %c0_i32 = arith.constant 0 : i32
    %2 = arith.addi %1, %c0_i32 : i32
    %c0 = arith.constant 0 : index
    %3 = arith.index_cast %2 : i32 to index
    %c0_0 = arith.constant 0 : index
    %c0_1 = arith.constant 0 : index
    %4 = vector.load %arg2[%c0, %3, %c0_0, %c0_1] : memref<1x18x18x4xf32, #tpu.memory_space<vmem>>, vector<1x4x16x4xf32>
    %5 = vector.shape_cast %4 : vector<1x4x16x4xf32> to vector<4x16x4xf32>
    %c0_i32_2 = arith.constant 0 : i32
    %6 = arith.addi %1, %c0_i32_2 : i32
    %c0_3 = arith.constant 0 : index
    %7 = arith.index_cast %6 : i32 to index
    %c1 = arith.constant 1 : index
    %c0_4 = arith.constant 0 : index
    %8 = vector.load %arg2[%c0_3, %7, %c1, %c0_4] : memref<1x18x18x4xf32, #tpu.memory_space<vmem>>, vector<1x4x16x4xf32>
    %9 = vector.shape_cast %8 : vector<1x4x16x4xf32> to vector<4x16x4xf32>
    %c0_i32_5 = arith.constant 0 : i32
    %10 = arith.addi %1, %c0_i32_5 : i32
    %c0_6 = arith.constant 0 : index
    %11 = arith.index_cast %10 : i32 to index
    %c2 = arith.constant 2 : index
    %c0_7 = arith.constant 0 : index
    %12 = vector.load %arg2[%c0_6, %11, %c2, %c0_7] : memref<1x18x18x4xf32, #tpu.memory_space<vmem>>, vector<1x4x16x4xf32>
    %13 = vector.shape_cast %12 : vector<1x4x16x4xf32> to vector<4x16x4xf32>
    %c1_i32 = arith.constant 1 : i32
    %14 = arith.addi %1, %c1_i32 : i32
    %c0_8 = arith.constant 0 : index
    %15 = arith.index_cast %14 : i32 to index
    %c0_9 = arith.constant 0 : index
    %c0_10 = arith.constant 0 : index
    %16 = vector.load %arg2[%c0_8, %15, %c0_9, %c0_10] : memref<1x18x18x4xf32, #tpu.memory_space<vmem>>, vector<1x4x16x4xf32>
    %17 = vector.shape_cast %16 : vector<1x4x16x4xf32> to vector<4x16x4xf32>
    %c1_i32_11 = arith.constant 1 : i32
    %18 = arith.addi %1, %c1_i32_11 : i32
    %c0_12 = arith.constant 0 : index
    %19 = arith.index_cast %18 : i32 to index
    %c1_13 = arith.constant 1 : index
    %c0_14 = arith.constant 0 : index
    %20 = vector.load %arg2[%c0_12, %19, %c1_13, %c0_14] : memref<1x18x18x4xf32, #tpu.memory_space<vmem>>, vector<1x4x16x4xf32>
    %21 = vector.shape_cast %20 : vector<1x4x16x4xf32> to vector<4x16x4xf32>
    %c1_i32_15 = arith.constant 1 : i32
    %22 = arith.addi %1, %c1_i32_15 : i32
    %c0_16 = arith.constant 0 : index
    %23 = arith.index_cast %22 : i32 to index
    %c2_17 = arith.constant 2 : index
    %c0_18 = arith.constant 0 : index
    %24 = vector.load %arg2[%c0_16, %23, %c2_17, %c0_18] : memref<1x18x18x4xf32, #tpu.memory_space<vmem>>, vector<1x4x16x4xf32>
    %25 = vector.shape_cast %24 : vector<1x4x16x4xf32> to vector<4x16x4xf32>
    %c2_i32 = arith.constant 2 : i32
    %26 = arith.addi %1, %c2_i32 : i32
    %c0_19 = arith.constant 0 : index
    %27 = arith.index_cast %26 : i32 to index
    %c0_20 = arith.constant 0 : index
    %c0_21 = arith.constant 0 : index
    %28 = vector.load %arg2[%c0_19, %27, %c0_20, %c0_21] : memref<1x18x18x4xf32, #tpu.memory_space<vmem>>, vector<1x4x16x4xf32>
    %29 = vector.shape_cast %28 : vector<1x4x16x4xf32> to vector<4x16x4xf32>
    %c2_i32_22 = arith.constant 2 : i32
    %30 = arith.addi %1, %c2_i32_22 : i32
    %c0_23 = arith.constant 0 : index
    %31 = arith.index_cast %30 : i32 to index
    %c1_24 = arith.constant 1 : index
    %c0_25 = arith.constant 0 : index
    %32 = vector.load %arg2[%c0_23, %31, %c1_24, %c0_25] : memref<1x18x18x4xf32, #tpu.memory_space<vmem>>, vector<1x4x16x4xf32>
    %33 = vector.shape_cast %32 : vector<1x4x16x4xf32> to vector<4x16x4xf32>
    %c2_i32_26 = arith.constant 2 : i32
    %34 = arith.addi %1, %c2_i32_26 : i32
    %c0_27 = arith.constant 0 : index
    %35 = arith.index_cast %34 : i32 to index
    %c2_28 = arith.constant 2 : index
    %c0_29 = arith.constant 0 : index
    %36 = vector.load %arg2[%c0_27, %35, %c2_28, %c0_29] : memref<1x18x18x4xf32, #tpu.memory_space<vmem>>, vector<1x4x16x4xf32>
    %37 = vector.shape_cast %36 : vector<1x4x16x4xf32> to vector<4x16x4xf32>
    %38 = tpu.concatenate %5, %9, %13, %17, %21, %25, %29, %33, %37 in 2 : vector<4x16x4xf32>, vector<4x16x4xf32>, vector<4x16x4xf32>, vector<4x16x4xf32>, vector<4x16x4xf32>, vector<4x16x4xf32>, vector<4x16x4xf32>, vector<4x16x4xf32>, vector<4x16x4xf32> -> vector<4x16x36xf32>
    %39 = vector.shape_cast %38 : vector<4x16x36xf32> to vector<64x36xf32>
    %c0_30 = arith.constant 0 : index
    %c0_31 = arith.constant 0 : index
    %40 = vector.load %arg3[%c0_30, %c0_31] : memref<36x128xf32, #tpu.memory_space<vmem>>, vector<36x128xf32>
    %cst = arith.constant dense<0.000000e+00> : vector<64x128xf32>
    %41 = tpu.matmul %39, %40, %cst {dimension_numbers = #tpu.dot_dimension_numbers<[1], [0], [0], [1], [0, 0, 1, 1], [], []>} : vector<64x36xf32>, vector<36x128xf32>, vector<64x128xf32> -> vector<64x128xf32>
    %c0_32 = arith.constant 0 : index
    %c0_33 = arith.constant 0 : index
    %c0_34 = arith.constant 0 : index
    %42 = vector.load %arg4[%c0_32, %c0_33, %c0_34] : memref<1x64x128xf32, #tpu.memory_space<vmem>>, vector<1x64x128xf32>
    %43 = vector.shape_cast %42 : vector<1x64x128xf32> to vector<64x128xf32>
    %44 = vector.shape_cast %41 : vector<64x128xf32> to vector<1x64x128xf32>
    tpu.vector_store %arg4[%c0_32, %c0_33, %c0_34], %44 {strides = array<i32>} : memref<1x64x128xf32, #tpu.memory_space<vmem>>, vector<1x64x128xf32>,
    %c0_i32_35 = arith.constant 0 : i32
    %45 = arith.cmpi eq, %arg1, %c0_i32_35 : i32
    %46 = arith.extui %45 : i1 to i32
    %c0_i32_36 = arith.constant 0 : i32
    %47 = arith.cmpi ne, %46, %c0_i32_36 : i32
    scf.if %47 {
      %cst_51 = arith.constant 0.000000e+00 : f32
      %59 = vector.broadcast %cst_51 : f32 to vector<1x1x128xf32>
      %c0_52 = arith.constant 0 : index
      %c0_53 = arith.constant 0 : index
      %c0_54 = arith.constant 0 : index
      %60 = vector.load %arg5[%c0_52, %c0_53, %c0_54] : memref<1x1x128xf32, #tpu.memory_space<vmem>>, vector<1x1x128xf32>
      tpu.vector_store %arg5[%c0_52, %c0_53, %c0_54], %59 {strides = array<i32>} : memref<1x1x128xf32, #tpu.memory_space<vmem>>, vector<1x1x128xf32>,
      %cst_55 = arith.constant 0.000000e+00 : f32
      %61 = vector.broadcast %cst_55 : f32 to vector<1x1x128xf32>
      %c0_56 = arith.constant 0 : index
      %c0_57 = arith.constant 0 : index
      %c0_58 = arith.constant 0 : index
      %62 = vector.load %arg6[%c0_56, %c0_57, %c0_58] : memref<1x1x128xf32, #tpu.memory_space<vmem>>, vector<1x1x128xf32>
      tpu.vector_store %arg6[%c0_56, %c0_57, %c0_58], %61 {strides = array<i32>} : memref<1x1x128xf32, #tpu.memory_space<vmem>>, vector<1x1x128xf32>,
    } else {
    }
    %c0_37 = arith.constant 0 : index
    %c0_38 = arith.constant 0 : index
    %c0_39 = arith.constant 0 : index
    %48 = vector.load %arg5[%c0_37, %c0_38, %c0_39] : memref<1x1x128xf32, #tpu.memory_space<vmem>>, vector<1x1x128xf32>
    %cst_40 = arith.constant dense<0.000000e+00> : vector<128xf32>
    %49 = vector.multi_reduction <add>, %41, %cst_40 [0] : vector<64x128xf32> to vector<128xf32>
    %50 = vector.shape_cast %49 : vector<128xf32> to vector<1x1x128xf32>
    %51 = arith.addf %48, %50 : vector<1x1x128xf32>
    %c0_41 = arith.constant 0 : index
    %c0_42 = arith.constant 0 : index
    %c0_43 = arith.constant 0 : index
    %52 = vector.load %arg5[%c0_41, %c0_42, %c0_43] : memref<1x1x128xf32, #tpu.memory_space<vmem>>, vector<1x1x128xf32>
    tpu.vector_store %arg5[%c0_41, %c0_42, %c0_43], %51 {strides = array<i32>} : memref<1x1x128xf32, #tpu.memory_space<vmem>>, vector<1x1x128xf32>,
    %c0_44 = arith.constant 0 : index
    %c0_45 = arith.constant 0 : index
    %c0_46 = arith.constant 0 : index
    %53 = vector.load %arg6[%c0_44, %c0_45, %c0_46] : memref<1x1x128xf32, #tpu.memory_space<vmem>>, vector<1x1x128xf32>
    %54 = arith.mulf %41, %41 : vector<64x128xf32>
    %cst_47 = arith.constant dense<0.000000e+00> : vector<128xf32>
    %55 = vector.multi_reduction <add>, %54, %cst_47 [0] : vector<64x128xf32> to vector<128xf32>
    %56 = vector.shape_cast %55 : vector<128xf32> to vector<1x1x128xf32>
    %57 = arith.addf %53, %56 : vector<1x1x128xf32>
    %c0_48 = arith.constant 0 : index
    %c0_49 = arith.constant 0 : index
    %c0_50 = arith.constant 0 : index
    %58 = vector.load %arg6[%c0_48, %c0_49, %c0_50] : memref<1x1x128xf32, #tpu.memory_space<vmem>>, vector<1x1x128xf32>
    tpu.vector_store %arg6[%c0_48, %c0_49, %c0_50], %57 {strides = array<i32>} : memref<1x1x128xf32, #tpu.memory_space<vmem>>, vector<1x1x128xf32>,
    return
  }
  func.func @transform_0(%arg0: i32, %arg1: i32) -> (i32, i32, i32, i32) {
    %c0_i32 = arith.constant 0 : i32
    %c0_i32_0 = arith.constant 0 : i32
    %c0_i32_1 = arith.constant 0 : i32
    %c0_i32_2 = arith.constant 0 : i32
    return %arg0, %c0_i32, %c0_i32_0, %c0_i32_1 : i32, i32, i32, i32
  }
  func.func @transform_1(%arg0: i32, %arg1: i32) -> (i32, i32) {
    %c0_i32 = arith.constant 0 : i32
    %c0_i32_0 = arith.constant 0 : i32
    %c0_i32_1 = arith.constant 0 : i32
    return %c0_i32, %c0_i32_0 : i32, i32
  }
  func.func @transform_2(%arg0: i32, %arg1: i32) -> (i32, i32, i32) {
    %c0_i32 = arith.constant 0 : i32
    %c0_i32_0 = arith.constant 0 : i32
    return %arg0, %arg1, %c0_i32 : i32, i32, i32
  }
  func.func @transform_3(%arg0: i32, %arg1: i32) -> (i32, i32, i32) {
    %c0_i32 = arith.constant 0 : i32
    %c0_i32_0 = arith.constant 0 : i32
    %c0_i32_1 = arith.constant 0 : i32
    return %arg0, %c0_i32, %c0_i32_0 : i32, i32, i32
  }
  func.func @transform_4(%arg0: i32, %arg1: i32) -> (i32, i32, i32) {
    %c0_i32 = arith.constant 0 : i32
    %c0_i32_0 = arith.constant 0 : i32
    %c0_i32_1 = arith.constant 0 : i32
    return %arg0, %c0_i32, %c0_i32_0 : i32, i32, i32
  }
}

module attributes {stable_mosaic.version = 11 : i64} {
  func.func @_bn_lrelu_kernel(%arg0: i32, %arg1: i32, %arg2: memref<1x256x128xf32, #tpu.memory_space<vmem>>, %arg3: memref<1x128xf32, #tpu.memory_space<vmem>>, %arg4: memref<1x128xf32, #tpu.memory_space<vmem>>, %arg5: memref<1x256x128xf32, #tpu.memory_space<vmem>>) attributes {dimension_semantics = [#tpu.dimension_semantics<parallel>, #tpu.dimension_semantics<parallel>], iteration_bounds = array<i64: 2, 1>, scalar_prefetch = 0 : i64, scratch_operands = 0 : i64, tpu.core_type = #tpu.core_type<tc>, window_params = [{transform_indices = @transform_0, window_bounds = array<i64: 1, 256, 128>}, {pipeline_mode = #tpu.pipeline_mode<synchronous>, transform_indices = @transform_1, window_bounds = array<i64: 1, 128>}, {pipeline_mode = #tpu.pipeline_mode<synchronous>, transform_indices = @transform_2, window_bounds = array<i64: 1, 128>}, {transform_indices = @transform_3, window_bounds = array<i64: 1, 256, 128>}]} {
    %c0 = arith.constant 0 : index
    %c0_0 = arith.constant 0 : index
    %c0_1 = arith.constant 0 : index
    %0 = vector.load %arg2[%c0, %c0_0, %c0_1] : memref<1x256x128xf32, #tpu.memory_space<vmem>>, vector<1x256x128xf32>
    %c0_2 = arith.constant 0 : index
    %c0_3 = arith.constant 0 : index
    %1 = vector.load %arg3[%c0_2, %c0_3] : memref<1x128xf32, #tpu.memory_space<vmem>>, vector<1x128xf32>
    %2 = vector.shape_cast %1 : vector<1x128xf32> to vector<1x1x128xf32>
    %3 = vector.broadcast %2 : vector<1x1x128xf32> to vector<1x256x128xf32>
    %4 = arith.mulf %0, %3 : vector<1x256x128xf32>
    %c0_4 = arith.constant 0 : index
    %c0_5 = arith.constant 0 : index
    %5 = vector.load %arg4[%c0_4, %c0_5] : memref<1x128xf32, #tpu.memory_space<vmem>>, vector<1x128xf32>
    %6 = vector.shape_cast %5 : vector<1x128xf32> to vector<1x1x128xf32>
    %7 = vector.broadcast %6 : vector<1x1x128xf32> to vector<1x256x128xf32>
    %8 = arith.addf %4, %7 : vector<1x256x128xf32>
    %cst = arith.constant 0.000000e+00 : f32
    %9 = vector.broadcast %cst : f32 to vector<1x256x128xf32>
    %10 = arith.cmpf ogt, %8, %9 : vector<1x256x128xf32>
    %cst_6 = arith.constant 2.000000e-01 : f32
    %11 = vector.broadcast %cst_6 : f32 to vector<1x256x128xf32>
    %12 = arith.mulf %11, %8 : vector<1x256x128xf32>
    %13 = arith.select %10, %8, %12 : vector<1x256x128xi1>, vector<1x256x128xf32>
    %c0_7 = arith.constant 0 : index
    %c0_8 = arith.constant 0 : index
    %c0_9 = arith.constant 0 : index
    %14 = vector.load %arg5[%c0_7, %c0_8, %c0_9] : memref<1x256x128xf32, #tpu.memory_space<vmem>>, vector<1x256x128xf32>
    tpu.vector_store %arg5[%c0_7, %c0_8, %c0_9], %13 {strides = array<i32>} : memref<1x256x128xf32, #tpu.memory_space<vmem>>, vector<1x256x128xf32>,
    return
  }
  func.func @transform_0(%arg0: i32, %arg1: i32) -> (i32, i32, i32) {
    %c0_i32 = arith.constant 0 : i32
    %c0_i32_0 = arith.constant 0 : i32
    return %arg0, %arg1, %c0_i32 : i32, i32, i32
  }
  func.func @transform_1(%arg0: i32, %arg1: i32) -> (i32, i32) {
    %c0_i32 = arith.constant 0 : i32
    %c0_i32_0 = arith.constant 0 : i32
    %c0_i32_1 = arith.constant 0 : i32
    return %c0_i32, %c0_i32_0 : i32, i32
  }
  func.func @transform_2(%arg0: i32, %arg1: i32) -> (i32, i32) {
    %c0_i32 = arith.constant 0 : i32
    %c0_i32_0 = arith.constant 0 : i32
    %c0_i32_1 = arith.constant 0 : i32
    return %c0_i32, %c0_i32_0 : i32, i32
  }
  func.func @transform_3(%arg0: i32, %arg1: i32) -> (i32, i32, i32) {
    %c0_i32 = arith.constant 0 : i32
    %c0_i32_0 = arith.constant 0 : i32
    return %arg0, %arg1, %c0_i32 : i32, i32, i32
  }
}

</mosaic_0001>

<bundles_post_ra>
// kernel: conv2d_block_forward.3
= control target key start
LH: loop header
LB: loop body
LE: loop exit
PB: predicated region body
PF: predicated region fallthrough
CT: control target
= control target key end

     0   :  { %s618_s12 = smov 0   ;;  %s620_s13 = smov 0   ;;  %s850_s0 = inlined_call_operand.vmem [shape: f32[2,256,128], index: 0, kind: input, shape index: {}, may-alias: {0,3}]   ;;  %s851_s1 = inlined_call_operand.vmem [shape: f32[1,128], index: 1, kind: input, shape index: {}]   ;;  %s852_s2 = inlined_call_operand.vmem [shape: f32[1,128], index: 2, kind: input, shape index: {}]   ;;  %s853_s3 = inlined_call_operand.vmem [shape: f32[2,256,128], index: 3, kind: output, shape index: {}, may-alias: {0,3}]  }
   0x1   :  { %s622_s14 = smov 0  }
   0x2 LB: > { %s25_s15 = sadd.s32 1, %s592_s13  ;;  %p539_p0 = scmp.ge.s32.totalorder %s596_s14, 1  ;;  %s596_s14 = sphi %s622_s14, %s13_s14   ;;  %s592_s13 = sphi %s620_s13, %s855_s13   ;;  %s588_s12 = sphi %s618_s12, %s854_s12  }
   0x3   : > { %p27_p1 = scmp.ge.s32.totalorder %s25_s15, 2  ;;  %p158_p2 = scmp.lt.s32.totalorder %s596_s14, 3 }
   0x5   : > { %s857_s15 = smov (%p27_p1, %s25_s15), 0  ;;  %p159_p3 = pnand %p539_p0, %p158_p2 }
   0x6   : > { %p191_p4 = scmp.lt.s32.totalorder (!%p159_p3), %s588_s12, 1 }
   0x7   : > { %162 = sbr.rel (%p159_p3) target bundleno = 60 (0x3c), region = 32 }
   0xc   : > { %s859_s12 = smov (!%p191_p4, %s588_s12), 1  ;;  %v642_v0 = vld [vmem:[%s851_s1] ss:$0 sm:$0xff] }
   0xd   : > { %s548_s16 = sshll.u32 %s859_s12, 8  ;;  %v654_v1 = vld [vmem:[%s852_s2] ss:$0 sm:$0xff] }
   0xe   : > { %s649_s21 = scalar_lea.vmem %s850_s0, %s548_s16  ;;  %s691_s26 = scalar_lea.vmem %s853_s3, %s548_s16 }
   0xf   : > { %v210_v2 = vld [vmem:[%s649_s21] sm:$0xff]  ;;  %v211_v3 = vld [vmem:[%s649_s21 + $0x8] sm:$0xff]  ;;  %v212_v4 = vld [vmem:[%s649_s21 + $0x10] sm:$0xff] }
  0x10   : > { %v213_v5 = vld [vmem:[%s649_s21 + $0x18] sm:$0xff]  ;;  %v214_v6 = vld [vmem:[%s649_s21 + $0x20] sm:$0xff]  ;;  %v215_v7 = vld [vmem:[%s649_s21 + $0x28] sm:$0xff]  ;;  %v249_v8 = vmul.f32 %v642_v0, %v210_v2  ;;  %v250_v9 = vmul.f32 %v642_v0, %v211_v3  ;;  %v251_v10 = vmul.f32 %v642_v0, %v212_v4 }
  0x11   : > { %v216_v11 = vld [vmem:[%s649_s21 + $0x30] sm:$0xff]  ;;  %v217_v12 = vld [vmem:[%s649_s21 + $0x38] sm:$0xff]  ;;  %v218_v13 = vld [vmem:[%s649_s21 + $0x40] sm:$0xff]  ;;  %v252_v14 = vmul.f32 %v642_v0, %v213_v5  ;;  %v253_v15 = vmul.f32 %v642_v0, %v214_v6  ;;  %v254_v16 = vmul.f32 %v642_v0, %v215_v7 }
  0x12   : > { %v219_v17 = vld [vmem:[%s649_s21 + $0x48] sm:$0xff]  ;;  %v288_v18 = vadd.f32 %v654_v1, %v249_v8  ;;  %v289_v19 = vadd.f32 %v654_v1, %v250_v9  ;;  %v290_v20 = vadd.f32 %v654_v1, %v251_v10  ;;  %v255_v21 = vmul.f32 %v642_v0, %v216_v11  ;;  %v220_v29 = vld [vmem:[%s649_s21 + $0x50] sm:$0xff]  ;;  %v221_v36 = vld [vmem:[%s649_s21 + $0x58] sm:$0xff] }
  0x13   : > { %v291_v22 = vadd.f32 %v654_v1, %v252_v14  ;;  %v292_v23 = vadd.f32 %v654_v1, %v253_v15  ;;  %v293_v24 = vadd.f32 %v654_v1, %v254_v16  ;;  %v256_v25 = vmul.f32 %v642_v0, %v217_v12  ;;  %v222_v37 = vld [vmem:[%s649_s21 + $0x60] sm:$0xff]  ;;  %v223_v38 = vld [vmem:[%s649_s21 + $0x68] sm:$0xff]  ;;  %v224_v39 = vld [vmem:[%s649_s21 + $0x70] sm:$0xff] }
  0x14   : > { %vm320_vm0 = vcmp.gt.f32.partialorder %v288_v18, 0.0  ;;  %v352_v26 = vmul.f32 0.2, %v288_v18  ;;  %v294_v27 = vadd.f32 %v654_v1, %v255_v21  ;;  %v257_v28 = vmul.f32 %v642_v0, %v218_v13  ;;  %v225_v40 = vld [vmem:[%s649_s21 + $0x78] sm:$0xff]  ;;  %v699_v41 = vld [vmem:[%s649_s21 + $0x80] sm:$0xff]  ;;  %v702_v42 = vld [vmem:[%s649_s21 + $0x88] sm:$0xff] }
  0x15   : > { %vm321_vm1 = vcmp.gt.f32.partialorder %v289_v19, 0.0  ;;  %v353_v30 = vmul.f32 0.2, %v289_v19  ;;  %v295_v31 = vadd.f32 %v654_v1, %v256_v25  ;;  %v258_v32 = vmul.f32 %v642_v0, %v219_v17  ;;  %v705_v43 = vld [vmem:[%s649_s21 + $0x90] sm:$0xff]  ;;  %v708_v44 = vld [vmem:[%s649_s21 + $0x98] sm:$0xff]  ;;  %v711_v45 = vld [vmem:[%s649_s21 + $0xa0] sm:$0xff] }
  0x16   : > { %v384_v33 = vsel %vm320_vm0, %v288_v18, %v352_v26  ;;  %vm322_vm2 = vcmp.gt.f32.partialorder %v290_v20, 0.0  ;;  %v354_v34 = vmul.f32 0.2, %v290_v20  ;;  %v296_v35 = vadd.f32 %v654_v1, %v257_v28  ;;  %v714_v46 = vld [vmem:[%s649_s21 + $0xa8] sm:$0xff]  ;;  %v717_v47 = vld [vmem:[%s649_s21 + $0xb0] sm:$0xff]  ;;  %v720_v48 = vld [vmem:[%s649_s21 + $0xb8] sm:$0xff] }
  0x17   : > { %v723_v49 = vld [vmem:[%s649_s21 + $0xc0] sm:$0xff]  ;;  %v726_v50 = vld [vmem:[%s649_s21 + $0xc8] sm:$0xff]  ;;  %v729_v51 = vld [vmem:[%s649_s21 + $0xd0] sm:$0xff]  ;;  %v385_v52 = vsel %vm321_vm1, %v289_v19, %v353_v30  ;;  %vm323_vm3 = vcmp.gt.f32.partialorder %v291_v22, 0.0  ;;  %v355_v53 = vmul.f32 0.2, %v291_v22  ;;  %v297_v54 = vadd.f32 %v654_v1, %v258_v32 }
  0x18   : > { %v734_v55 = vld [vmem:[%s649_s21 + $0xd8] sm:$0xff]  ;;  %v737_v56 = vld [vmem:[%s649_s21 + $0xe0] sm:$0xff]  ;;  %v740_v57 = vld [vmem:[%s649_s21 + $0xe8] sm:$0xff]  ;;  %v386_v58 = vsel %vm322_vm2, %v290_v20, %v354_v34  ;;  %vm324_vm4 = vcmp.gt.f32.partialorder %v292_v23, 0.0  ;;  %v356_v59 = vmul.f32 0.2, %v292_v23  ;;  %v259_v60 = vmul.f32 %v642_v0, %v220_v29 }
  0x19   : > { %v745_v61 = vld [vmem:[%s649_s21 + $0xf0] sm:$0xff]  ;;  %v748_v62 = vld [vmem:[%s649_s21 + $0xf8] sm:$0xff]  ;;  %v387_v63 = vsel %vm323_vm3, %v291_v22, %v355_v53  ;;  %vm325_vm5 = vcmp.gt.f32.partialorder %v293_v24, 0.0  ;;  %v357_v2 = vmul.f32 0.2, %v293_v24  ;;  %vm326_vm6 = vcmp.gt.f32.partialorder %v294_v27, 0.0 }
  0x1a   : > { %416 = vst [vmem:[%s691_s26] sm:$0xff] %v384_v33  ;;  %417 = vst [vmem:[%s691_s26 + $0x8] sm:$0xff] %v385_v52  ;;  %v388_v3 = vsel %vm324_vm4, %v292_v23, %v356_v59  ;;  %v358_v4 = vmul.f32 0.2, %v294_v27  ;;  %vm327_vm7 = vcmp.gt.f32.partialorder %v295_v31, 0.0  ;;  %v359_v5 = vmul.f32 0.2, %v295_v31 }
  0x1b   : > { %418 = vst [vmem:[%s691_s26 + $0x10] sm:$0xff] %v386_v58  ;;  %419 = vst [vmem:[%s691_s26 + $0x18] sm:$0xff] %v387_v63  ;;  %v389_v6 = vsel %vm325_vm5, %v293_v24, %v357_v2  ;;  %vm328_vm8 = vcmp.gt.f32.partialorder %v296_v35, 0.0  ;;  %v360_v7 = vmul.f32 0.2, %v296_v35  ;;  %vm329_vm9 = vcmp.gt.f32.partialorder %v297_v54, 0.0 }
  0x1c   : > { %420 = vst [vmem:[%s691_s26 + $0x20] sm:$0xff] %v388_v3  ;;  %421 = vst [vmem:[%s691_s26 + $0x28] sm:$0xff] %v389_v6  ;;  %v390_v8 = vsel %vm326_vm6, %v294_v27, %v358_v4  ;;  %v391_v9 = vsel %vm327_vm7, %v295_v31, %v359_v5  ;;  %v361_v10 = vmul.f32 0.2, %v297_v54  ;;  %v298_v11 = vadd.f32 %v654_v1, %v259_v60 }
  0x1d   : > { %422 = vst [vmem:[%s691_s26 + $0x30] sm:$0xff] %v390_v8  ;;  %423 = vst [vmem:[%s691_s26 + $0x38] sm:$0xff] %v391_v9  ;;  %v392_v12 = vsel %vm328_vm8, %v296_v35, %v360_v7  ;;  %v260_v13 = vmul.f32 %v642_v0, %v221_v36  ;;  %v261_v14 = vmul.f32 %v642_v0, %v222_v37 }
  0x1e   : > { %v262_v15 = vmul.f32 %v642_v0, %v223_v38  ;;  %424 = vst [vmem:[%s691_s26 + $0x40] sm:$0xff] %v392_v12  ;;  %v393_v16 = vsel %vm329_vm9, %v297_v54, %v361_v10  ;;  %vm330_vm10 = vcmp.gt.f32.partialorder %v298_v11, 0.0  ;;  %v362_v17 = vmul.f32 0.2, %v298_v11 }
  0x1f   : > { %v263_v18 = vmul.f32 %v642_v0, %v224_v39  ;;  %425 = vst [vmem:[%s691_s26 + $0x48] sm:$0xff] %v393_v16  ;;  %v299_v19 = vadd.f32 %v654_v1, %v260_v13  ;;  %v300_v20 = vadd.f32 %v654_v1, %v261_v14  ;;  %v264_v22 = vmul.f32 %v642_v0, %v225_v40 }
  0x20   : > { %v301_v21 = vadd.f32 %v654_v1, %v262_v15  ;;  %v394_v23 = vsel %vm330_vm10, %v298_v11, %v362_v17  ;;  %v265_v25 = vmul.f32 %v642_v0, %v699_v41  ;;  %v266_v26 = vmul.f32 %v642_v0, %v702_v42 }
  0x21   : > { %v302_v24 = vadd.f32 %v654_v1, %v263_v18  ;;  %426 = vst [vmem:[%s691_s26 + $0x50] sm:$0xff] %v394_v23  ;;  %vm331_vm11 = vcmp.gt.f32.partialorder %v299_v19, 0.0  ;;  %v363_v27 = vmul.f32 0.2, %v299_v19  ;;  %vm332_vm12 = vcmp.gt.f32.partialorder %v300_v20, 0.0 }
  0x22   : > { %v364_v28 = vmul.f32 0.2, %v300_v20  ;;  %vm333_vm13 = vcmp.gt.f32.partialorder %v301_v21, 0.0  ;;  %v365_v29 = vmul.f32 0.2, %v301_v21  ;;  %v303_v33 = vadd.f32 %v654_v1, %v264_v22 }
  0x23   : > { %vm334_vm14 = vcmp.gt.f32.partialorder %v302_v24, 0.0  ;;  %v366_v30 = vmul.f32 0.2, %v302_v24  ;;  %v395_v31 = vsel %vm331_vm11, %v299_v19, %v363_v27  ;;  %v304_v34 = vadd.f32 %v654_v1, %v265_v25 }
  0x24   : > { %v396_v32 = vsel %vm332_vm12, %v300_v20, %v364_v28  ;;  %427 = vst [vmem:[%s691_s26 + $0x58] sm:$0xff] %v395_v31  ;;  %v397_v35 = vsel %vm333_vm13, %v301_v21, %v365_v29  ;;  %v305_v37 = vadd.f32 %v654_v1, %v266_v26  ;;  %v267_v38 = vmul.f32 %v642_v0, %v705_v43 }
  0x25   : > { %428 = vst [vmem:[%s691_s26 + $0x60] sm:$0xff] %v396_v32  ;;  %v398_v36 = vsel %vm334_vm14, %v302_v24, %v366_v30  ;;  %429 = vst [vmem:[%s691_s26 + $0x68] sm:$0xff] %v397_v35  ;;  %vm335_vm15 = vcmp.gt.f32.partialorder %v303_v33, 0.0  ;;  %v367_v39 = vmul.f32 0.2, %v303_v33  ;;  %vm336_vm0 = vcmp.gt.f32.partialorder %v304_v34, 0.0 }
  0x26   : > { %430 = vst [vmem:[%s691_s26 + $0x70] sm:$0xff] %v398_v36  ;;  %v368_v40 = vmul.f32 0.2, %v304_v34  ;;  %vm337_vm1 = vcmp.gt.f32.partialorder %v305_v37, 0.0  ;;  %v369_v41 = vmul.f32 0.2, %v305_v37  ;;  %v306_v42 = vadd.f32 %v654_v1, %v267_v38 }
  0x27   : > { %v268_v52 = vmul.f32 %v642_v0, %v708_v44  ;;  %v399_v53 = vsel %vm335_vm15, %v303_v33, %v367_v39  ;;  %v269_v43 = vmul.f32 %v642_v0, %v711_v45  ;;  %v270_v58 = vmul.f32 %v642_v0, %v714_v46 }
  0x28   : > { %v400_v54 = vsel %vm336_vm0, %v304_v34, %v368_v40  ;;  %431 = vst [vmem:[%s691_s26 + $0x78] sm:$0xff] %v399_v53  ;;  %v401_v59 = vsel %vm337_vm1, %v305_v37, %v369_v41  ;;  %vm338_vm2 = vcmp.gt.f32.partialorder %v306_v42, 0.0  ;;  %v370_v60 = vmul.f32 0.2, %v306_v42 }
  0x29   : > { %432 = vst [vmem:[%s691_s26 + $0x80] sm:$0xff] %v400_v54  ;;  %v307_v63 = vadd.f32 %v654_v1, %v268_v52  ;;  %433 = vst [vmem:[%s691_s26 + $0x88] sm:$0xff] %v401_v59  ;;  %v308_v2 = vadd.f32 %v654_v1, %v269_v43  ;;  %v309_v44 = vadd.f32 %v654_v1, %v270_v58 }
  0x2a   : > { %v271_v45 = vmul.f32 %v642_v0, %v717_v47  ;;  %v272_v46 = vmul.f32 %v642_v0, %v720_v48  ;;  %v402_v3 = vsel %vm338_vm2, %v306_v42, %v370_v60  ;;  %v273_v5 = vmul.f32 %v642_v0, %v723_v49 }
  0x2b   : > { %vm339_vm3 = vcmp.gt.f32.partialorder %v307_v63, 0.0  ;;  %v371_v4 = vmul.f32 0.2, %v307_v63  ;;  %434 = vst [vmem:[%s691_s26 + $0x90] sm:$0xff] %v402_v3  ;;  %vm340_vm4 = vcmp.gt.f32.partialorder %v308_v2, 0.0  ;;  %vm341_vm5 = vcmp.gt.f32.partialorder %v309_v44, 0.0 }
  0x2c   : > { %v372_v6 = vmul.f32 0.2, %v308_v2  ;;  %v373_v7 = vmul.f32 0.2, %v309_v44  ;;  %v310_v9 = vadd.f32 %v654_v1, %v271_v45  ;;  %v311_v47 = vadd.f32 %v654_v1, %v272_v46 }
  0x2d   : > { %v403_v8 = vsel %vm339_vm3, %v307_v63, %v371_v4  ;;  %v312_v48 = vadd.f32 %v654_v1, %v273_v5  ;;  %v274_v12 = vmul.f32 %v642_v0, %v726_v50  ;;  %v275_v49 = vmul.f32 %v642_v0, %v729_v51 }
  0x2e   : > { %435 = vst [vmem:[%s691_s26 + $0x98] sm:$0xff] %v403_v8  ;;  %v404_v10 = vsel %vm340_vm4, %v308_v2, %v372_v6  ;;  %v405_v11 = vsel %vm341_vm5, %v309_v44, %v373_v7  ;;  %vm342_vm6 = vcmp.gt.f32.partialorder %v310_v9, 0.0  ;;  %v374_v13 = vmul.f32 0.2, %v310_v9 }
  0x2f   : > { %436 = vst [vmem:[%s691_s26 + $0xa0] sm:$0xff] %v404_v10  ;;  %437 = vst [vmem:[%s691_s26 + $0xa8] sm:$0xff] %v405_v11  ;;  %vm343_vm7 = vcmp.gt.f32.partialorder %v311_v47, 0.0  ;;  %v375_v14 = vmul.f32 0.2, %v311_v47  ;;  %vm344_vm8 = vcmp.gt.f32.partialorder %v312_v48, 0.0  ;;  %v313_v16 = vadd.f32 %v654_v1, %v274_v12 }
  0x30   : > { %v376_v15 = vmul.f32 0.2, %v312_v48  ;;  %v314_v17 = vadd.f32 %v654_v1, %v275_v49  ;;  %v406_v18 = vsel %vm342_vm6, %v310_v9, %v374_v13  ;;  %v276_v19 = vmul.f32 %v642_v0, %v734_v55 }
  0x31   : > { %v407_v50 = vsel %vm343_vm7, %v311_v47, %v375_v14  ;;  %v277_v51 = vmul.f32 %v642_v0, %v737_v56  ;;  %438 = vst [vmem:[%s691_s26 + $0xb0] sm:$0xff] %v406_v18  ;;  %vm345_vm9 = vcmp.gt.f32.partialorder %v313_v16, 0.0  ;;  %v377_v21 = vmul.f32 0.2, %v313_v16 }
  0x32   : > { %439 = vst [vmem:[%s691_s26 + $0xb8] sm:$0xff] %v407_v50  ;;  %v408_v20 = vsel %vm344_vm8, %v312_v48, %v376_v15  ;;  %vm346_vm10 = vcmp.gt.f32.partialorder %v314_v17, 0.0  ;;  %v378_v22 = vmul.f32 0.2, %v314_v17  ;;  %v315_v23 = vadd.f32 %v654_v1, %v276_v19 }
  0x33   : > { %440 = vst [vmem:[%s691_s26 + $0xc0] sm:$0xff] %v408_v20  ;;  %v316_v24 = vadd.f32 %v654_v1, %v277_v51  ;;  %v278_v55 = vmul.f32 %v642_v0, %v740_v57  ;;  %v409_v25 = vsel %vm345_vm9, %v313_v16, %v377_v21  ;;  %v279_v56 = vmul.f32 %v642_v0, %v745_v61 }
  0x34   : > { %v280_v26 = vmul.f32 %v642_v0, %v748_v62  ;;  %441 = vst [vmem:[%s691_s26 + $0xc8] sm:$0xff] %v409_v25  ;;  %v410_v27 = vsel %vm346_vm10, %v314_v17, %v378_v22  ;;  %vm347_vm11 = vcmp.gt.f32.partialorder %v315_v23, 0.0  ;;  %v379_v28 = vmul.f32 0.2, %v315_v23 }
  0x35   : > { %vm348_vm12 = vcmp.gt.f32.partialorder %v316_v24, 0.0  ;;  %442 = vst [vmem:[%s691_s26 + $0xd0] sm:$0xff] %v410_v27  ;;  %v380_v29 = vmul.f32 0.2, %v316_v24  ;;  %v317_v30 = vadd.f32 %v654_v1, %v278_v55  ;;  %v318_v57 = vadd.f32 %v654_v1, %v279_v56 }
  0x36   : > { %v319_v31 = vadd.f32 %v654_v1, %v280_v26  ;;  %v411_v61 = vsel %vm347_vm11, %v315_v23, %v379_v28 }
  0x37   : > { %443 = vst [vmem:[%s691_s26 + $0xd8] sm:$0xff] %v411_v61  ;;  %v412_v0 = vsel %vm348_vm12, %v316_v24, %v380_v29  ;;  %vm349_vm13 = vcmp.gt.f32.partialorder %v317_v30, 0.0  ;;  %v381_v62 = vmul.f32 0.2, %v317_v30  ;;  %vm350_vm14 = vcmp.gt.f32.partialorder %v318_v57, 0.0 }
  0x38   : > { %444 = vst [vmem:[%s691_s26 + $0xe0] sm:$0xff] %v412_v0  ;;  %v382_v32 = vmul.f32 0.2, %v318_v57  ;;  %vm351_vm15 = vcmp.gt.f32.partialorder %v319_v31, 0.0  ;;  %v383_v33 = vmul.f32 0.2, %v319_v31 }
  0x39   : > { %v413_v34 = vsel %vm349_vm13, %v317_v30, %v381_v62 }
  0x3a   : > { %445 = vst [vmem:[%s691_s26 + $0xe8] sm:$0xff] %v413_v34  ;;  %v414_v35 = vsel %vm350_vm14, %v318_v57, %v382_v32  ;;  %v415_v36 = vsel %vm351_vm15, %v319_v31, %v383_v33 }
  0x3b   : > { %446 = vst [vmem:[%s691_s26 + $0xf0] sm:$0xff] %v414_v35  ;;  %447 = vst [vmem:[%s691_s26 + $0xf8] sm:$0xff] %v415_v36 }
  0x3c PF: > { %s13_s14 = sadd.s32 1, %s596_s14   ;;  %s854_s12 = smov %s592_s13 }
  0x3d   : > { %p10_p5 = scmp.ge.s32.totalorder %s13_s14, 4   ;;  %s855_s13 = smov %s857_s15 }
  0x3f   :  { %12 = sbr.rel (!%p10_p5) target bundleno = 2 (0x2), region = 62 }

// kernel: conv2d_block_forward.2
= control target key start
LH: loop header
LB: loop body
LE: loop exit
PB: predicated region body
PF: predicated region fallthrough
CT: control target
= control target key end

     0   :  { %s1228_s15 = smov 0   ;;  %s1230_s16 = smov 0   ;;  %s1593_s0 = inlined_call_operand.vmem [shape: f32[2,18,18,4], index: 0, kind: input, shape index: {}]   ;;  %s1594_s1 = inlined_call_operand.vmem [shape: f32[36,128], index: 1, kind: input, shape index: {}]   ;;  %s1595_s2 = inlined_call_operand.vmem [shape: f32[2,256,128], index: 2, kind: output, shape index: {0}]   ;;  %s1596_s3 = inlined_call_operand.vmem [shape: f32[2,1,128], index: 3, kind: output, shape index: {1}]   ;;  %s1597_s4 = inlined_call_operand.vmem [shape: f32[2,1,128], index: 4, kind: output, shape index: {2}]  }
   0x1   :  { %s1232_s17 = smov 0   ;;  %s1234_s18 = smov 0  }
   0x2   :  { %s1236_s19 = smov 0  }
   0x3 LB: > { %s24_s20 = sadd.s32 1, %s1184_s17  ;;  %s27_s21 = sadd.s32 1, %s1188_s18  ;;  %s1192_s19 = sphi %s1236_s19, %s15_s19   ;;  %s1188_s18 = sphi %s1234_s18, %s1601_s18   ;;  %s1184_s17 = sphi %s1232_s17, %s1600_s17   ;;  %s1180_s16 = sphi %s1230_s16, %s1599_s16   ;;  %s1176_s15 = sphi %s1228_s15, %s1598_s15  }
   0x4   : > { %p25_p0 = scmp.ge.s32.totalorder %s24_s20, 4  ;;  %p988_p1 = scmp.ge.s32.totalorder %s1192_s19, 1 }
   0x5   : > { %p181_p2 = scmp.lt.s32.totalorder %s1192_s19, 9 }
   0x6   : > { %s1603_s20 = smov (%p25_p0, %s24_s20), 0  ;;  %s1605_s21 = smov (!%p25_p0, %s27_s21), %s1188_s18 }
   0x7   : > { %p182_p3 = pnand %p988_p1, %p181_p2  ;;  %p29_p4 = scmp.ge.s32.totalorder %s1605_s21, 2 }
   0x8   : > { %p217_p5 = scmp.lt.s32.totalorder (!%p182_p3), %s1180_s16, 1  ;;  %s994_s22 = smul.u32 (!%p182_p3), 96, %s1176_s15 }
   0x9   : > { %s1607_s21 = smov (%p29_p4, %s1605_s21), 0  ;;  %185 = sbr.rel (%p182_p3) target bundleno = 489 (0x1e9), region = 28 }
   0xa   : > { %s1194_s8 = smov (!%p182_p3), 4   ;;  %s1195_s9 = smov (!%p182_p3), 8  }
   0xb   : > { %s1196_s10 = smov (!%p182_p3), 12   ;;  %s1197_s11 = smov (!%p182_p3), 16  }
   0xc   : > { %s1198_s12 = smov (!%p182_p3), 20   ;;  %s1199_s13 = smov (!%p182_p3), 24  }
   0xd   : > { %s1200_s14 = smov (!%p182_p3), 28   ;;  %p1056_p7 = scmp.ne.s32.totalorder (!%p182_p3), %s1176_s15, 0 }
   0xe   : > { %s1609_s16 = smov (!%p217_p5, %s1180_s16), 1  ;;  %v651_v25 = vld [vmem:[%s1594_s1 + $0x20] sm:$0xf]  ;;  %vm677_vm0 = vcmask 1043456   ;;  %v650_v26 = vld [vmem:[%s1594_s1 + $0x18] sm:$0xff]  ;;  %v649_v27 = vld [vmem:[%s1594_s1 + $0x10] sm:$0xff] }
   0xf   : > { %s1104_s23 = smul.u32 432, %s1609_s16  ;;  %s1268_s26 = scalar_lea.vmem %s1596_s3, %s1609_s16  ;;  %1072 = vmatprep.subr.msk.mxu0 %vm677_vm0, %v651_v25  ;;  %1094 = vmatprep.subr.msk.mxu1 %vm677_vm0, %v651_v25  ;;  %v648_v29 = vld [vmem:[%s1594_s1 + $0x8] sm:$0xff]  ;;  %v647_v31 = vld [vmem:[%s1594_s1] sm:$0xff]  ;;  %vm575_vm1 = vcmask 31744   ;;  %vm584_vm2 = vcmask 64512   ;;  %vm593_vm3 = vcmask 97280  }
  0x10   : > { %s1274_s29 = scalar_lea.vmem %s1597_s4, %s1609_s16  ;;  %1073 = vmatpush3.msk.msra.mxu0 %vm677_vm0, %v651_v25  ;;  %1099 = vmatpush3.msk.msra.mxu1 %vm677_vm0, %v651_v25  ;;  %vm602_vm4 = vcmask 130048   ;;  %vm611_vm5 = vcmask 162816   ;;  %vm620_vm6 = vcmask 195584   ;;  %vm629_vm7 = vcmask 228352  }
  0x11   : > { %s221_s6 = scalar_lea.vmem %s1593_s0, %s1104_s23  ;;  %1074 = vmatprep.subr.mxu0 %v650_v26  ;;  %1095 = vmatprep.subr.mxu1 %v650_v26  ;;  %vm638_vm8 = vcmask 261120   ;;  %vm652_vm9 = vcmask 293888  }
  0x12   : > { %s1279_s7 = scalar_lea.vmem %s221_s6, %s994_s22  ;;  %1075 = vmatpush3.msra.mxu0 %v650_v26  ;;  %1100 = vmatpush3.msra.mxu1 %v650_v26 }
  0x13   : > { %v250_v0 = vld [vmem:[%s1279_s7 + $0x9] sm:$0xff]  ;;  %v249_v1 = vld [vmem:[%s1279_s7 + $0x1] sm:$0xff]  ;;  %v1286_v2 = vld [vmem:[%s1279_s7 + $0x39] sm:$0xff]  ;;  %1076 = vmatprep.subr.mxu0 %v649_v27  ;;  %1096 = vmatprep.subr.mxu1 %v649_v27 }
  0x14   : > { %329 = vrot.lane.b32.xlu1 %v250_v0, %s1194_s8  ;;  %327 = vrot.lane.b32.xlu0 %v249_v1, %s1194_s8  ;;  %v1289_v3 = vld [vmem:[%s1279_s7 + $0x31] sm:$0xff]  ;;  %v257_v5 = vld [vmem:[%s1279_s7 + $0x2] sm:$0xff] }
  0x15   : > { %v1296_v4 = vld [vmem:[%s1279_s7 + $0x32] sm:$0xff]  ;;  %v1303_v6 = vld [vmem:[%s1279_s7 + $0x3a] sm:$0xff]  ;;  %v258_v7 = vld [vmem:[%s1279_s7 + $0xa] sm:$0xff]  ;;  %1077 = vmatpush3.msra.mxu0 %v649_v27  ;;  %1101 = vmatpush3.msra.mxu1 %v649_v27 }
  0x16   : > { %v1310_v8 = vld [vmem:[%s1279_s7 + $0x48] sm:$0xff]  ;;  %v1313_v9 = vld [vmem:[%s1279_s7 + $0x18] sm:$0xff]  ;;  %v1320_v10 = vld [vmem:[%s1279_s7 + $0x50] sm:$0xff]  ;;  %1078 = vmatprep.subr.mxu0 %v648_v29  ;;  %1097 = vmatprep.subr.mxu1 %v648_v29 }
  0x17   : > { %v1323_v11 = vld [vmem:[%s1279_s7 + $0x20] sm:$0xff]  ;;  %v1330_v12 = vld [vmem:[%s1279_s7 + $0x49] sm:$0xff]  ;;  %v1340_v14 = vld [vmem:[%s1279_s7 + $0x51] sm:$0xff]  ;;  %1079 = vmatpush3.msra.mxu0 %v648_v29  ;;  %1102 = vmatpush3.msra.mxu1 %v648_v29 }
  0x18   : > { %337 = vrot.lane.b32.xlu1 %v1286_v2, %s1194_s8  ;;  %335 = vrot.lane.b32.xlu0 %v1289_v3, %s1194_s8  ;;  %v1005_v13 = vld [vmem:[%s1279_s7 + $0x19] sm:$0xff]  ;;  %v1006_v15 = vld [vmem:[%s1279_s7 + $0x21] sm:$0xff] }
  0x19   : > { %v1347_v16 = vld [vmem:[%s1279_s7 + $0x4a] sm:$0xff]  ;;  %v1013_v17 = vld [vmem:[%s1279_s7 + $0x1a] sm:$0xff]  ;;  %v1360_v18 = vld [vmem:[%s1279_s7 + $0x52] sm:$0xff]  ;;  %1080 = vmatprep.subr.mxu0 %v647_v31  ;;  %1098 = vmatprep.subr.mxu1 %v647_v31 }
  0x1a   : > { %v1014_v19 = vld [vmem:[%s1279_s7 + $0x22] sm:$0xff]  ;;  %v1368_v21 = vld [vmem:[%s1279_s7 + $0x30] sm:$0xff]  ;;  %v1381_v23 = vld [vmem:[%s1279_s7 + $0x38] sm:$0xff]  ;;  %1081 = vmatpush3.msra.mxu0 %v647_v31  ;;  %1103 = vmatpush3.msra.mxu1 %v647_v31 }
  0x1b   : > { %v1027_v20 = vld [vmem:[%s1279_s7 + $0x60] sm:$0xff]  ;;  %v1028_v22 = vld [vmem:[%s1279_s7 + $0x68] sm:$0xff]  ;;  %v1029_v33 = vld [vmem:[%s1279_s7 + $0x78] sm:$0xff] }
  0x1c   : > { %367 = vrot.lane.b32.xlu1 %v1296_v4, %s1195_s9  ;;  %359 = vrot.lane.b32.xlu0 %v257_v5, %s1195_s9  ;;  %v1035_v24 = vld [vmem:[%s1279_s7 + $0x61] sm:$0xff]  ;;  %v1036_v28 = vld [vmem:[%s1279_s7 + $0x69] sm:$0xff] }
  0x1d   : > { %v1043_v30 = vld [vmem:[%s1279_s7 + $0x62] sm:$0xff]  ;;  %v1044_v32 = vld [vmem:[%s1279_s7 + $0x6a] sm:$0xff]  ;;  %v1037_v35 = vld [vmem:[%s1279_s7 + $0x79] sm:$0xff] }
  0x1e   : > { %v1030_v34 = vld [vmem:[%s1279_s7 + $0x80] sm:$0xff]  ;;  %v242_v36 = vld [vmem:[%s1279_s7 + $0x8] sm:$0xff] }
  0x1f   : > { %v241_v37 = vld [vmem:[%s1279_s7] sm:$0xff] }
  0x20   : > { %369 = vrot.lane.b32.xlu1 %v1303_v6, %s1195_s9  ;;  %361 = vrot.lane.b32.xlu0 %v258_v7, %s1195_s9  ;;  %v1038_v38 = vld [vmem:[%s1279_s7 + $0x81] sm:$0xff] }
  0x21   : > { %v1045_v43 = vld [vmem:[%s1279_s7 + $0x7a] sm:$0xff]  ;;  %v1046_v47 = vld [vmem:[%s1279_s7 + $0x82] sm:$0xff]  ;;  %s990_s7 = sshll.u32 %s1176_s15, 3 }
  0x22   : > { %p225_p6 = scmp.lt.s32.totalorder %s990_s7, 31 }
  0x24   : > { %399 = vrot.lane.b32.xlu1 %v1310_v8, %s1196_s10  ;;  %391 = vrot.lane.b32.xlu0 %v1313_v9, %s1196_s10  ;;  %s1611_s7 = smov (!%p225_p6, %s990_s7), 31 }
  0x28   : > { %401 = vrot.lane.b32.xlu1 %v1320_v10, %s1196_s10  ;;  %393 = vrot.lane.b32.xlu0 %v1323_v11, %s1196_s10 }
  0x2c   : > { %431 = vrot.lane.b32.xlu1 %v1330_v12, %s1197_s11  ;;  %423 = vrot.lane.b32.xlu0 %v1005_v13, %s1197_s11 }
  0x30   : > { %339 = vrot.lane.b32.xlu1 %v1330_v12, %s1194_s8  ;;  %331 = vrot.lane.b32.xlu0 %v1005_v13, %s1194_s8 }
  0x34   : > { %433 = vrot.lane.b32.xlu1 %v1340_v14, %s1197_s11  ;;  %425 = vrot.lane.b32.xlu0 %v1006_v15, %s1197_s11 }
  0x38   : > { %463 = vrot.lane.b32.xlu1 %v1347_v16, %s1198_s12  ;;  %455 = vrot.lane.b32.xlu0 %v1013_v17, %s1198_s12 }
  0x3c   : > { %341 = vrot.lane.b32.xlu1 %v1340_v14, %s1194_s8  ;;  %333 = vrot.lane.b32.xlu0 %v1006_v15, %s1194_s8 }
  0x40   : > { %371 = vrot.lane.b32.xlu1 %v1347_v16, %s1195_s9  ;;  %363 = vrot.lane.b32.xlu0 %v1013_v17, %s1195_s9 }
  0x44   : > { %465 = vrot.lane.b32.xlu1 %v1360_v18, %s1198_s12  ;;  %457 = vrot.lane.b32.xlu0 %v1014_v19, %s1198_s12 }
  0x48   : > { %495 = vrot.lane.b32.xlu1 %v1027_v20, %s1199_s13  ;;  %487 = vrot.lane.b32.xlu0 %v1368_v21, %s1199_s13 }
  0x4c   : > { %373 = vrot.lane.b32.xlu1 %v1360_v18, %s1195_s9  ;;  %365 = vrot.lane.b32.xlu0 %v1014_v19, %s1195_s9  ;;  %s1201_s9 = smov 32  }
  0x50   : > { %403 = vrot.lane.b32.xlu1 %v1027_v20, %s1196_s10  ;;  %395 = vrot.lane.b32.xlu0 %v1368_v21, %s1196_s10 }
  0x54   : > { %497 = vrot.lane.b32.xlu1 %v1028_v22, %s1199_s13  ;;  %489 = vrot.lane.b32.xlu0 %v1381_v23, %s1199_s13 }
  0x58   : > { %527 = vrot.lane.b32.xlu1 %v1035_v24, %s1200_s14  ;;  %519 = vrot.lane.b32.xlu0 %v1289_v3, %s1200_s14 }
  0x5c   : > { %405 = vrot.lane.b32.xlu1 %v1028_v22, %s1196_s10  ;;  %397 = vrot.lane.b32.xlu0 %v1381_v23, %s1196_s10  ;;  %s991_s10 = sshll.u32 %s1609_s16, 5 }
  0x60   : > { %435 = vrot.lane.b32.xlu1 %v1035_v24, %s1197_s11  ;;  %427 = vrot.lane.b32.xlu0 %v1289_v3, %s1197_s11 }
  0x64   : > { %529 = vrot.lane.b32.xlu1 %v1036_v28, %s1200_s14  ;;  %521 = vrot.lane.b32.xlu0 %v1286_v2, %s1200_s14 }
  0x68   : > { %559 = vrot.lane.b32.xlu1 %v1043_v30, %s1201_s9  ;;  %551 = vrot.lane.b32.xlu0 %v1296_v4, %s1201_s9 }
  0x6c   : > { %437 = vrot.lane.b32.xlu1 %v1036_v28, %s1197_s11  ;;  %429 = vrot.lane.b32.xlu0 %v1286_v2, %s1197_s11  ;;  %s228_s11 = sadd.s32 %s991_s10, %s1611_s7 }
  0x70   : > { %467 = vrot.lane.b32.xlu1 %v1043_v30, %s1198_s12  ;;  %459 = vrot.lane.b32.xlu0 %v1296_v4, %s1198_s12 }
  0x74   : > { %561 = vrot.lane.b32.xlu1 %v1044_v32, %s1201_s9  ;;  %553 = vrot.lane.b32.xlu0 %v1303_v6, %s1201_s9 }
  0x78   : > { %469 = vrot.lane.b32.xlu1 %v1044_v32, %s1198_s12  ;;  %461 = vrot.lane.b32.xlu0 %v1303_v6, %s1198_s12  ;;  %s992_s12 = sshll.u32 %s228_s11, 3 }
  0x79   : > { %s230_s22 = scalar_lea.vmem %s1595_s2, %s992_s12 }
  0x7c   : > { %499 = vrot.lane.b32.xlu1 %v1029_v33, %s1199_s13  ;;  %491 = vrot.lane.b32.xlu0 %v1310_v8, %s1199_s13 }
  0x80   : > { %501 = vrot.lane.b32.xlu1 %v1030_v34, %s1199_s13  ;;  %493 = vrot.lane.b32.xlu0 %v1320_v10, %s1199_s13 }
  0x84   : > { %531 = vrot.lane.b32.xlu1 %v1037_v35, %s1200_s14  ;;  %523 = vrot.lane.b32.xlu0 %v1330_v12, %s1200_s14 }
  0x86   : > { %v330_v39 = vpop.permute.xlu1 %329  ;;  %v328_v40 = vpop.permute.xlu0 %327 }
  0x87   : > { %v577_v41 = vsel %vm575_vm1, %v242_v36, %v330_v39  ;;  %v576_v42 = vsel %vm575_vm1, %v241_v37, %v328_v40 }
  0x88   : > { %533 = vrot.lane.b32.xlu1 %v1038_v38, %s1200_s14  ;;  %525 = vrot.lane.b32.xlu0 %v1340_v14, %s1200_s14 }
  0x8a   : > { %v338_v44 = vpop.permute.xlu1 %337  ;;  %v336_v45 = vpop.permute.xlu0 %335 }
  0x8b   : > { %v581_v46 = vsel %vm575_vm1, %v1381_v23, %v338_v44  ;;  %v580_v48 = vsel %vm575_vm1, %v1368_v21, %v336_v45 }
  0x8c   : > { %563 = vrot.lane.b32.xlu1 %v1045_v43, %s1201_s9  ;;  %555 = vrot.lane.b32.xlu0 %v1347_v16, %s1201_s9 }
  0x8e   : > { %v368_v49 = vpop.permute.xlu1 %367  ;;  %v360_v50 = vpop.permute.xlu0 %359 }
  0x8f   : > { %v589_v51 = vsel %vm584_vm2, %v580_v48, %v368_v49  ;;  %v585_v52 = vsel %vm584_vm2, %v576_v42, %v360_v50 }
  0x90   : > { %565 = vrot.lane.b32.xlu1 %v1046_v47, %s1201_s9  ;;  %557 = vrot.lane.b32.xlu0 %v1360_v18, %s1201_s9 }
  0x92   : > { %v370_v53 = vpop.permute.xlu1 %369  ;;  %v362_v54 = vpop.permute.xlu0 %361 }
  0x93   : > { %v590_v55 = vsel %vm584_vm2, %v581_v46, %v370_v53  ;;  %v586_v56 = vsel %vm584_vm2, %v577_v41, %v362_v54 }
  0x96   : > { %v400_v57 = vpop.permute.xlu1 %399  ;;  %v392_v58 = vpop.permute.xlu0 %391 }
  0x97   : > { %v598_v33 = vsel %vm593_vm3, %v589_v51, %v400_v57  ;;  %v594_v34 = vsel %vm593_vm3, %v585_v52, %v392_v58 }
  0x9a   : > { %v402_v59 = vpop.permute.xlu1 %401  ;;  %v394_v60 = vpop.permute.xlu0 %393 }
  0x9b   : > { %v1469_v61 = vsel %vm593_vm3, %v590_v55, %v402_v59  ;;  %v1472_v62 = vsel %vm593_vm3, %v586_v56, %v394_v60 }
  0x9e   : > { %v432_v63 = vpop.permute.xlu1 %431  ;;  %v424_v0 = vpop.permute.xlu0 %423 }
  0x9f   : > { %v607_v37 = vsel %vm602_vm4, %v598_v33, %v432_v63  ;;  %v603_v38 = vsel %vm602_vm4, %v594_v34, %v424_v0 }
  0xa2   : > { %v340_v1 = vpop.permute.xlu1 %339  ;;  %v332_v2 = vpop.permute.xlu0 %331 }
  0xa3   : > { %v582_v13 = vsel %vm575_vm1, %v1310_v8, %v340_v1  ;;  %v578_v14 = vsel %vm575_vm1, %v1313_v9, %v332_v2 }
  0xa6   : > { %v434_v3 = vpop.permute.xlu1 %433  ;;  %v426_v4 = vpop.permute.xlu0 %425 }
  0xa7   : > { %v608_v53 = vsel %vm602_vm4, %v1469_v61, %v434_v3  ;;  %v604_v54 = vsel %vm602_vm4, %v1472_v62, %v426_v4 }
  0xaa   : > { %v464_v5 = vpop.permute.xlu1 %463  ;;  %v456_v6 = vpop.permute.xlu0 %455 }
  0xab   : > { %v616_v39 = vsel %vm611_vm5, %v607_v37, %v464_v5  ;;  %v612_v40 = vsel %vm611_vm5, %v603_v38, %v456_v6 }
  0xae   : > { %v1474_v7 = vpop.permute.xlu1 %341  ;;  %v1476_v12 = vpop.permute.xlu0 %333 }
  0xb2   : > { %v372_v15 = vpop.permute.xlu1 %371  ;;  %v364_v16 = vpop.permute.xlu0 %363 }
  0xb3   : > { %v1483_v17 = vsel %vm584_vm2, %v582_v13, %v372_v15  ;;  %v1486_v18 = vsel %vm584_vm2, %v578_v14, %v364_v16 }
  0xb6   : > { %v466_v19 = vpop.permute.xlu1 %465  ;;  %v458_v20 = vpop.permute.xlu0 %457 }
  0xb7   : > { %v617_v55 = vsel %vm611_vm5, %v608_v53, %v466_v19  ;;  %v613_v56 = vsel %vm611_vm5, %v604_v54, %v458_v20 }
  0xba   : > { %v496_v21 = vpop.permute.xlu1 %495  ;;  %v488_v22 = vpop.permute.xlu0 %487 }
  0xbb   : > { %v625_v41 = vsel %vm620_vm6, %v616_v39, %v496_v21  ;;  %v621_v42 = vsel %vm620_vm6, %v612_v40, %v488_v22 }
  0xbe   : > { %v1488_v23 = vpop.permute.xlu1 %373  ;;  %v1490_v24 = vpop.permute.xlu0 %365 }
  0xc2   : > { %v404_v8 = vpop.permute.xlu1 %403  ;;  %v396_v25 = vpop.permute.xlu0 %395 }
  0xc3   : > { %v600_v15 = vsel %vm593_vm3, %v1483_v17, %v404_v8  ;;  %v596_v16 = vsel %vm593_vm3, %v1486_v18, %v396_v25 }
  0xc6   : > { %v498_v26 = vpop.permute.xlu1 %497  ;;  %v490_v9 = vpop.permute.xlu0 %489 }
  0xc7   : > { %v626_v57 = vsel %vm620_vm6, %v617_v55, %v498_v26  ;;  %v622_v58 = vsel %vm620_vm6, %v613_v56, %v490_v9  ;;  %v583_v26 = vsel %vm575_vm1, %v1320_v10, %v1474_v7  ;;  %v579_v9 = vsel %vm575_vm1, %v1323_v11, %v1476_v12 }
  0xc8   : > { %v592_v18 = vsel %vm584_vm2, %v583_v26, %v1488_v23  ;;  %v588_v8 = vsel %vm584_vm2, %v579_v9, %v1490_v24 }
  0xca   : > { %v528_v27 = vpop.permute.xlu1 %527  ;;  %v520_v28 = vpop.permute.xlu0 %519 }
  0xcb   : > { %v634_v43 = vsel %vm629_vm7, %v625_v41, %v528_v27  ;;  %v630_v44 = vsel %vm629_vm7, %v621_v42, %v520_v28 }
  0xce   : > { %v1492_v29 = vpop.permute.xlu1 %405  ;;  %v1494_v30 = vpop.permute.xlu0 %397 }
  0xcf   : > { %v601_v10 = vsel %vm593_vm3, %v592_v18, %v1492_v29  ;;  %v597_v11 = vsel %vm593_vm3, %v588_v8, %v1494_v30 }
  0xd2   : > { %v436_v31 = vpop.permute.xlu1 %435  ;;  %v428_v32 = vpop.permute.xlu0 %427 }
  0xd3   : > { %v609_v21 = vsel %vm602_vm4, %v600_v15, %v436_v31  ;;  %v605_v22 = vsel %vm602_vm4, %v596_v16, %v428_v32 }
  0xd6   : > { %v530_v35 = vpop.permute.xlu1 %529  ;;  %v522_v36 = vpop.permute.xlu0 %521 }
  0xd7   : > { %v635_v59 = vsel %vm629_vm7, %v626_v57, %v530_v35  ;;  %v631_v60 = vsel %vm629_vm7, %v622_v58, %v522_v36 }
  0xda   : > { %v560_v45 = vpop.permute.xlu1 %559  ;;  %v552_v46 = vpop.permute.xlu0 %551 }
  0xdb   : > { %v639_v47 = vsel %vm638_vm8, %v630_v44, %v552_v46  ;;  %v643_v48 = vsel %vm638_vm8, %v634_v43, %v560_v45 }
  0xdc   : > { %1082 = vmatprep.mubr.msk.f32.mxu0 %vm652_vm9, %v639_v47  ;;  %1088 = vmatprep.mubr.msk.f32.mxu1 %vm652_vm9, %v643_v48 }
  0xde   : > { %v438_v49 = vpop.permute.xlu1 %437  ;;  %v430_v50 = vpop.permute.xlu0 %429 }
  0xdf   : > { %v610_v23 = vsel %vm602_vm4, %v601_v10, %v438_v49  ;;  %v606_v24 = vsel %vm602_vm4, %v597_v11, %v430_v50 }
  0xe2   : > { %v468_v51 = vpop.permute.xlu1 %467  ;;  %v460_v52 = vpop.permute.xlu0 %459 }
  0xe3   : > { %v618_v27 = vsel %vm611_vm5, %v609_v21, %v468_v51  ;;  %v614_v17 = vsel %vm611_vm5, %v605_v22, %v460_v52 }
  0xe6   : > { %v562_v63 = vpop.permute.xlu1 %561  ;;  %v554_v0 = vpop.permute.xlu0 %553 }
  0xe7   : > { %v644_v1 = vsel %vm638_vm8, %v635_v59, %v562_v63  ;;  %v640_v61 = vsel %vm638_vm8, %v631_v60, %v554_v0 }
  0xe8   : > { %1083 = vmatmul.mubr.msk.f32.vlgmr.msra.gmra.mxu0 %vm652_vm9, %v640_v61  ;;  %1089 = vmatmul.mubr.msk.f32.vlgmr.msra.gmra.mxu1 %vm652_vm9, %v644_v1 }
  0xea   : > { %v470_v62 = vpop.permute.xlu1 %469  ;;  %v462_v2 = vpop.permute.xlu0 %461 }
  0xeb   : > { %v619_v29 = vsel %vm611_vm5, %v610_v23, %v470_v62  ;;  %v615_v35 = vsel %vm611_vm5, %v606_v24, %v462_v2 }
  0xee   : > { %v500_v3 = vpop.permute.xlu1 %499  ;;  %v492_v4 = vpop.permute.xlu0 %491 }
  0xef   : > { %v627_v25 = vsel %vm620_vm6, %v618_v27, %v500_v3  ;;  %v623_v28 = vsel %vm620_vm6, %v614_v17, %v492_v4 }
  0xf2   : > { %v502_v5 = vpop.permute.xlu1 %501  ;;  %v494_v6 = vpop.permute.xlu0 %493 }
  0xf3   : > { %v628_v30 = vsel %vm620_vm6, %v619_v29, %v502_v5  ;;  %v624_v36 = vsel %vm620_vm6, %v615_v35, %v494_v6 }
  0xf6   : > { %v532_v13 = vpop.permute.xlu1 %531  ;;  %v524_v14 = vpop.permute.xlu0 %523 }
  0xf7   : > { %v636_v7 = vsel %vm629_vm7, %v627_v25, %v532_v13  ;;  %v632_v12 = vsel %vm629_vm7, %v623_v28, %v524_v14 }
  0xfa   : > { %v534_v19 = vpop.permute.xlu1 %533  ;;  %v526_v20 = vpop.permute.xlu0 %525 }
  0xfb   : > { %v637_v37 = vsel %vm629_vm7, %v628_v30, %v534_v19  ;;  %v633_v38 = vsel %vm629_vm7, %v624_v36, %v526_v20 }
  0xfe   : > { %v564_v31 = vpop.permute.xlu1 %563  ;;  %v556_v32 = vpop.permute.xlu0 %555 }
  0xff   : > { %v645_v33 = vsel %vm638_vm8, %v636_v7, %v564_v31  ;;  %v641_v34 = vsel %vm638_vm8, %v632_v12, %v556_v32 }
 0x100   : > { %1085 = vmatprep.mubr.msk.f32.mxu0 %vm652_vm9, %v641_v34  ;;  %1091 = vmatprep.mubr.msk.f32.mxu1 %vm652_vm9, %v645_v33 }
 0x102   : > { %v566_v39 = vpop.permute.xlu1 %565  ;;  %v558_v40 = vpop.permute.xlu0 %557 }
 0x103   : > { %v646_v41 = vsel %vm638_vm8, %v637_v37, %v566_v39  ;;  %v642_v42 = vsel %vm638_vm8, %v633_v38, %v558_v40 }
 0x104   : > { %1086 = vmatmul.mubr.msk.f32.gmra.mxu0 %vm652_vm9, %v642_v42  ;;  %1092 = vmatmul.mubr.msk.f32.gmra.mxu1 %vm652_vm9, %v646_v41 }
 0x1a8   : > { %v1084_v43 = vpop.f32.mrf.mxu0  ;;  %v1090_v44 = vpop.f32.mrf.mxu1 }
 0x1a9   : > { %787 = vst [vmem:[%s230_s22 + $0x8] sm:$0xff] %v1084_v43  ;;  %791 = vst [vmem:[%s230_s22 + $0x28] sm:$0xff] %v1090_v44 }
 0x1aa   : > { %v747_v45 = vpop.f32.mrf.mxu0  ;;  %v767_v46 = vpop.f32.mrf.mxu1 }
 0x1ab   : > { %786 = vst [vmem:[%s230_s22] sm:$0xff] %v747_v45  ;;  %790 = vst [vmem:[%s230_s22 + $0x20] sm:$0xff] %v767_v46 }
 0x1c3   : > { %797 = sbr.rel (%p1056_p7) target bundleno = 458 (0x1ca), region = 32 }
 0x1c4   : > { %v1087_v47 = vpop.f32.mrf.mxu0  ;;  %v1093_v48 = vpop.f32.mrf.mxu1 }
 0x1c5   : > { %789 = vst [vmem:[%s230_s22 + $0x18] sm:$0xff] %v1087_v47  ;;  %793 = vst [vmem:[%s230_s22 + $0x38] sm:$0xff] %v1093_v48 }
 0x1c6   : > { %v757_v49 = vpop.f32.mrf.mxu0  ;;  %v777_v50 = vpop.f32.mrf.mxu1 }
 0x1c7   : > { %788 = vst [vmem:[%s230_s22 + $0x10] sm:$0xff] %v757_v49  ;;  %792 = vst [vmem:[%s230_s22 + $0x30] sm:$0xff] %v777_v50 }
 0x1c8   : > { %v1202_v51 = vmov 0.0  }
 0x1c9   : > { %798 = vst [vmem:[%s1268_s26] sm:$0x1] %v1202_v51  ;;  %799 = vst [vmem:[%s1274_s29] sm:$0x1] %v1202_v51 }
 0x1ca PF: > { %v801_v52 = vadd.f32 %v1084_v43, %v747_v45  ;;  %v817_v53 = vmul.f32 %v747_v45, %v747_v45  ;;  %v818_v54 = vmul.f32 %v1084_v43, %v1084_v43  ;;  %v819_v55 = vmul.f32 %v757_v49, %v757_v49 }
 0x1cb   : > { %v820_v57 = vmul.f32 %v1087_v47, %v1087_v47  ;;  %v821_v60 = vmul.f32 %v767_v46, %v767_v46  ;;  %v822_v1 = vmul.f32 %v1090_v44, %v1090_v44  ;;  %v823_v2 = vmul.f32 %v777_v50, %v777_v50 }
 0x1cc   : > { %v802_v56 = vadd.f32 %v801_v52, %v757_v49  ;;  %v825_v58 = vadd.f32 %v818_v54, %v817_v53  ;;  %v824_v5 = vmul.f32 %v1093_v48, %v1093_v48 }
 0x1ce   : > { %v803_v59 = vadd.f32 %v1087_v47, %v802_v56  ;;  %v826_v63 = vadd.f32 %v825_v58, %v819_v55 }
 0x1d0   : > { %v804_v0 = vadd.f32 %v803_v59, %v767_v46  ;;  %v827_v61 = vadd.f32 %v826_v63, %v820_v57  ;;  %v800_v18 = vld [vmem:[%s1268_s26] sm:$0x1] }
 0x1d1   : > { %v816_v28 = vld [vmem:[%s1274_s29] sm:$0x1] }
 0x1d2   : > { %v805_v62 = vadd.f32 %v1090_v44, %v804_v0  ;;  %v828_v3 = vadd.f32 %v827_v61, %v821_v60 }
 0x1d4   : > { %v806_v4 = vadd.f32 %v805_v62, %v777_v50  ;;  %v829_v6 = vadd.f32 %v828_v3, %v822_v1 }
 0x1d6   : > { %v807_v13 = vadd.f32 %v1093_v48, %v806_v4  ;;  %v830_v14 = vadd.f32 %v829_v6, %v823_v2 }
 0x1d8   : > { %v808_v15 = vrot.slane %v807_v13, 4  ;;  %v831_v16 = vadd.f32 %v830_v14, %v824_v5 }
 0x1da   : > { %v809_v19 = vadd.f32 %v808_v15, %v807_v13  ;;  %v832_v20 = vrot.slane %v831_v16, 4 }
 0x1dc   : > { %v810_v21 = vrot.slane %v809_v19, 2  ;;  %v833_v22 = vadd.f32 %v832_v20, %v831_v16 }
 0x1de   : > { %v811_v26 = vadd.f32 %v810_v21, %v809_v19  ;;  %v834_v9 = vrot.slane %v833_v22, 2 }
 0x1e0   : > { %v812_v27 = vrot.slane %v811_v26, 1  ;;  %v835_v17 = vadd.f32 %v834_v9, %v833_v22 }
 0x1e2   : > { %v813_v8 = vadd.f32 %v812_v27, %v811_v26  ;;  %v836_v25 = vrot.slane %v835_v17, 1 }
 0x1e4   : > { %v814_v10 = vadd.f32 %v813_v8, %v800_v18  ;;  %v837_v11 = vadd.f32 %v836_v25, %v835_v17 }
 0x1e6   : > { %815 = vst [vmem:[%s1268_s26] sm:$0x1] %v814_v10  ;;  %v838_v7 = vadd.f32 %v837_v11, %v816_v28 }
 0x1e8   : > { %839 = vst [vmem:[%s1274_s29] sm:$0x1] %v838_v7 }
 0x1e9 PF: > { %s15_s19 = sadd.s32 1, %s1192_s19   ;;  %s1598_s15 = smov %s1184_s17 }
 0x1ea   : > { %p12_p8 = scmp.ge.s32.totalorder %s15_s19, 10   ;;  %s1599_s16 = smov %s1188_s18 }
 0x1eb   : > { %s1600_s17 = smov %s1603_s20  ;;  %s1601_s18 = smov %s1607_s21 }
 0x1ec   :  { %14 = sbr.rel (!%p12_p8) target bundleno = 3 (0x3), region = 89 }

</bundles_post_ra>
